<compile_context>
chip_gen: v6e
topology: v6e:2x2x1
jax: 0.10.0
libtpu: 0.0.40
codegen_flags: <defaults>
</compile_context>

<pallas_src>
import jax
import jax.numpy as jnp
from jax.experimental import pallas as pl
from jax.experimental.pallas import tpu as pltpu

LMAX = 3
SH_DIM = (LMAX + 1) ** 2          # 16 spherical-harmonic components
N_POINTS = 100                    # module default n_points=100 (kept as-is)


# ----------------------------------------------------------------------------
# Pallas kernel:
#   SH-basis evaluation (VPU) -> (D, N) scratch
#   signal evaluation (one MXU matmul on the concatenated (2X, D) coeffs)
#   abs / min / max / reductions / log  -> scalar loss
# ----------------------------------------------------------------------------
def iou_loss_kernel(xt_ref, rv_ref, out_ref, sh_ref):
    # xt_ref: (2*X, D)  rows [:X] = input coeffs, rows [X:] = target coeffs
    # rv_ref: (3, N)    unit direction components (x, y, z rows), lane-dense
    # sh_ref: (D, N)    VMEM scratch for the SH basis
    half = xt_ref.shape[0] // 2

    x = rv_ref[0:1, :]            # (1, N)
    y = rv_ref[1:2, :]
    z = rv_ref[2:3, :]
    one = jnp.ones_like(x)

    # Real spherical harmonics up to lmax=3, 'integral'-style normalization.
    # TODO(synk): e3nn's per-l component ordering / sign / normalization is
    # approximated with the standard real-SH convention (no e3nn dependency).
    c00 = 0.28209479177387814     # 1/(2 sqrt(pi))
    c1 = 0.4886025119029199       # sqrt(3/(4 pi))
    c2m2 = 1.0925484305920792
    c20 = 0.31539156525252005
    c22 = 0.5462742152960396
    c3m3 = 0.5900435899266435
    c3m2 = 2.890611442640554
    c3m1 = 0.4570457994644658
    c30 = 0.3731763325901154
    c32 = 1.445305721320277
    c33 = 0.5900435899266435

    rows = [
        c00 * one,                          # l=0
        c1 * y, c1 * z, c1 * x,             # l=1
        c2m2 * x * y,                       # l=2
        c2m2 * y * z,
        c20 * (3.0 * z * z - 1.0),
        c2m2 * x * z,
        c22 * (x * x - y * y),
        c3m3 * y * (3.0 * x * x - y * y),   # l=3
        c3m2 * x * y * z,
        c3m1 * y * (5.0 * z * z - 1.0),
        c30 * z * (5.0 * z * z - 3.0),
        c3m1 * x * (5.0 * z * z - 1.0),
        c32 * z * (x * x - y * y),
        c33 * x * (x * x - 3.0 * y * y),
    ]
    for i, r in enumerate(rows):            # 16 static single-row stores
        sh_ref[i:i + 1, :] = r

    # (2X, D) @ (D, N) -> (2X, N): one MXU push.
    sig = jnp.dot(xt_ref[...], sh_ref[...], preferred_element_type=jnp.float32)
    sa = jnp.abs(sig)
    xa = sa[:half, :]                       # evaluated input signal
    ta = sa[half:, :]                       # evaluated target signal

    mn_sum = jnp.sum(jnp.minimum(xa, ta), axis=(0, 1), keepdims=True)  # (1, 1)
    mx_sum = jnp.sum(jnp.maximum(xa, ta), axis=(0, 1), keepdims=True)  # (1, 1)

    # -log(mn/mx) == log(mx) - log(mn); mean over batch of 1 is a no-op.
    out_ref[...] = jnp.log(mx_sum) - jnp.log(mn_sum)


# ----------------------------------------------------------------------------
# Jitted wrapper: direction sampling + operand packing + kernel launch.
# ----------------------------------------------------------------------------
def _iou_loss_impl(inp, tgt, key):
    # Random unit directions, generated directly in lane-dense (3, N) layout.
    rv = jax.random.normal(key, (3, N_POINTS), dtype=jnp.float32)
    rv = rv / jnp.linalg.norm(rv, axis=0, keepdims=True)

    # Forward only ever uses batch index 0 (input[:1] / target[:1]).
    # Concatenate into one (2*X, D) operand -> single DMA, full sublane tile.
    xt = jnp.concatenate(
        [inp[0].astype(jnp.float32), tgt[0].astype(jnp.float32)], axis=0)

    two_x = xt.shape[0]
    cost = pl.CostEstimate(
        flops=2 * two_x * SH_DIM * N_POINTS,
        transcendentals=2,
        bytes_accessed=(two_x * SH_DIM + 3 * N_POINTS + 1) * 4,
    )

    out = pl.pallas_call(
        iou_loss_kernel,
        out_shape=jax.ShapeDtypeStruct((1, 1), jnp.float32),
        in_specs=[
            pl.BlockSpec(memory_space=pltpu.MemorySpace.VMEM),
            pl.BlockSpec(memory_space=pltpu.MemorySpace.VMEM),
        ],
        out_specs=pl.BlockSpec(memory_space=pltpu.MemorySpace.VMEM),
        scratch_shapes=[pltpu.VMEM((SH_DIM, N_POINTS), jnp.float32)],
        cost_estimate=cost,
    )(xt, rv)
    return out[0, 0]


iou_loss = jax.jit(_iou_loss_impl)


if __name__ == "__main__":
    key = jax.random.PRNGKey(0)
    k_in, k_tgt, k_dirs = jax.random.split(key, 3)

    B, X = 2, 4
    inp = jax.random.normal(k_in, (B, X, SH_DIM), dtype=jnp.float32)
    tgt = jax.random.normal(k_tgt, (B, X, SH_DIM), dtype=jnp.float32)

    loss = iou_loss(inp, tgt, k_dirs)
    jax.block_until_ready(loss)
    assert loss.shape == () and bool(jnp.isfinite(loss))
    print("KERNEL_OK")
</pallas_src>

<mosaic_0001>
module attributes {stable_mosaic.version = 11 : i64} {
  func.func @iou_loss_kernel(%arg0: memref<8x16xf32, #tpu.memory_space<vmem>>, %arg1: memref<3x100xf32, #tpu.memory_space<vmem>>, %arg2: memref<1x1xf32, #tpu.memory_space<vmem>>, %arg3: memref<16x100xf32, #tpu.memory_space<vmem>>) attributes {dimension_semantics = [], scalar_prefetch = 0 : i64, scratch_operands = 1 : i64, tpu.core_type = #tpu.core_type<tc>} {
    %c0 = arith.constant 0 : index
    %c0_0 = arith.constant 0 : index
    %0 = vector.load %arg1[%c0, %c0_0] : memref<3x100xf32, #tpu.memory_space<vmem>>, vector<1x100xf32>
    %c1 = arith.constant 1 : index
    %c0_1 = arith.constant 0 : index
    %1 = vector.load %arg1[%c1, %c0_1] : memref<3x100xf32, #tpu.memory_space<vmem>>, vector<1x100xf32>
    %c2 = arith.constant 2 : index
    %c0_2 = arith.constant 0 : index
    %2 = vector.load %arg1[%c2, %c0_2] : memref<3x100xf32, #tpu.memory_space<vmem>>, vector<1x100xf32>
    %cst = arith.constant 1.000000e+00 : f32
    %3 = vector.broadcast %cst : f32 to vector<1x100xf32>
    %cst_3 = arith.constant 0.282094806 : f32
    %4 = vector.broadcast %cst_3 : f32 to vector<1x100xf32>
    %5 = arith.mulf %4, %3 : vector<1x100xf32>
    %cst_4 = arith.constant 0.488602519 : f32
    %6 = vector.broadcast %cst_4 : f32 to vector<1x100xf32>
    %7 = arith.mulf %6, %1 : vector<1x100xf32>
    %cst_5 = arith.constant 0.488602519 : f32
    %8 = vector.broadcast %cst_5 : f32 to vector<1x100xf32>
    %9 = arith.mulf %8, %2 : vector<1x100xf32>
    %cst_6 = arith.constant 0.488602519 : f32
    %10 = vector.broadcast %cst_6 : f32 to vector<1x100xf32>
    %11 = arith.mulf %10, %0 : vector<1x100xf32>
    %cst_7 = arith.constant 1.09254849 : f32
    %12 = vector.broadcast %cst_7 : f32 to vector<1x100xf32>
    %13 = arith.mulf %12, %0 : vector<1x100xf32>
    %14 = arith.mulf %13, %1 : vector<1x100xf32>
    %cst_8 = arith.constant 1.09254849 : f32
    %15 = vector.broadcast %cst_8 : f32 to vector<1x100xf32>
    %16 = arith.mulf %15, %1 : vector<1x100xf32>
    %17 = arith.mulf %16, %2 : vector<1x100xf32>
    %cst_9 = arith.constant 3.000000e+00 : f32
    %18 = vector.broadcast %cst_9 : f32 to vector<1x100xf32>
    %19 = arith.mulf %18, %2 : vector<1x100xf32>
    %20 = arith.mulf %19, %2 : vector<1x100xf32>
    %cst_10 = arith.constant 1.000000e+00 : f32
    %21 = vector.broadcast %cst_10 : f32 to vector<1x100xf32>
    %22 = arith.subf %20, %21 : vector<1x100xf32>
    %cst_11 = arith.constant 0.31539157 : f32
    %23 = vector.broadcast %cst_11 : f32 to vector<1x100xf32>
    %24 = arith.mulf %23, %22 : vector<1x100xf32>
    %cst_12 = arith.constant 1.09254849 : f32
    %25 = vector.broadcast %cst_12 : f32 to vector<1x100xf32>
    %26 = arith.mulf %25, %0 : vector<1x100xf32>
    %27 = arith.mulf %26, %2 : vector<1x100xf32>
    %28 = arith.mulf %0, %0 : vector<1x100xf32>
    %29 = arith.mulf %1, %1 : vector<1x100xf32>
    %30 = arith.subf %28, %29 : vector<1x100xf32>
    %cst_13 = arith.constant 0.546274245 : f32
    %31 = vector.broadcast %cst_13 : f32 to vector<1x100xf32>
    %32 = arith.mulf %31, %30 : vector<1x100xf32>
    %cst_14 = arith.constant 0.590043604 : f32
    %33 = vector.broadcast %cst_14 : f32 to vector<1x100xf32>
    %34 = arith.mulf %33, %1 : vector<1x100xf32>
    %cst_15 = arith.constant 3.000000e+00 : f32
    %35 = vector.broadcast %cst_15 : f32 to vector<1x100xf32>
    %36 = arith.mulf %35, %0 : vector<1x100xf32>
    %37 = arith.mulf %36, %0 : vector<1x100xf32>
    %38 = arith.mulf %1, %1 : vector<1x100xf32>
    %39 = arith.subf %37, %38 : vector<1x100xf32>
    %40 = arith.mulf %34, %39 : vector<1x100xf32>
    %cst_16 = arith.constant 2.89061141 : f32
    %41 = vector.broadcast %cst_16 : f32 to vector<1x100xf32>
    %42 = arith.mulf %41, %0 : vector<1x100xf32>
    %43 = arith.mulf %42, %1 : vector<1x100xf32>
    %44 = arith.mulf %43, %2 : vector<1x100xf32>
    %cst_17 = arith.constant 0.457045794 : f32
    %45 = vector.broadcast %cst_17 : f32 to vector<1x100xf32>
    %46 = arith.mulf %45, %1 : vector<1x100xf32>
    %cst_18 = arith.constant 5.000000e+00 : f32
    %47 = vector.broadcast %cst_18 : f32 to vector<1x100xf32>
    %48 = arith.mulf %47, %2 : vector<1x100xf32>
    %49 = arith.mulf %48, %2 : vector<1x100xf32>
    %cst_19 = arith.constant 1.000000e+00 : f32
    %50 = vector.broadcast %cst_19 : f32 to vector<1x100xf32>
    %51 = arith.subf %49, %50 : vector<1x100xf32>
    %52 = arith.mulf %46, %51 : vector<1x100xf32>
    %cst_20 = arith.constant 0.373176336 : f32
    %53 = vector.broadcast %cst_20 : f32 to vector<1x100xf32>
    %54 = arith.mulf %53, %2 : vector<1x100xf32>
    %cst_21 = arith.constant 5.000000e+00 : f32
    %55 = vector.broadcast %cst_21 : f32 to vector<1x100xf32>
    %56 = arith.mulf %55, %2 : vector<1x100xf32>
    %57 = arith.mulf %56, %2 : vector<1x100xf32>
    %cst_22 = arith.constant 3.000000e+00 : f32
    %58 = vector.broadcast %cst_22 : f32 to vector<1x100xf32>
    %59 = arith.subf %57, %58 : vector<1x100xf32>
    %60 = arith.mulf %54, %59 : vector<1x100xf32>
    %cst_23 = arith.constant 0.457045794 : f32
    %61 = vector.broadcast %cst_23 : f32 to vector<1x100xf32>
    %62 = arith.mulf %61, %0 : vector<1x100xf32>
    %cst_24 = arith.constant 5.000000e+00 : f32
    %63 = vector.broadcast %cst_24 : f32 to vector<1x100xf32>
    %64 = arith.mulf %63, %2 : vector<1x100xf32>
    %65 = arith.mulf %64, %2 : vector<1x100xf32>
    %cst_25 = arith.constant 1.000000e+00 : f32
    %66 = vector.broadcast %cst_25 : f32 to vector<1x100xf32>
    %67 = arith.subf %65, %66 : vector<1x100xf32>
    %68 = arith.mulf %62, %67 : vector<1x100xf32>
    %cst_26 = arith.constant 1.44530571 : f32
    %69 = vector.broadcast %cst_26 : f32 to vector<1x100xf32>
    %70 = arith.mulf %69, %2 : vector<1x100xf32>
    %71 = arith.mulf %0, %0 : vector<1x100xf32>
    %72 = arith.mulf %1, %1 : vector<1x100xf32>
    %73 = arith.subf %71, %72 : vector<1x100xf32>
    %74 = arith.mulf %70, %73 : vector<1x100xf32>
    %cst_27 = arith.constant 0.590043604 : f32
    %75 = vector.broadcast %cst_27 : f32 to vector<1x100xf32>
    %76 = arith.mulf %75, %0 : vector<1x100xf32>
    %77 = arith.mulf %0, %0 : vector<1x100xf32>
    %cst_28 = arith.constant 3.000000e+00 : f32
    %78 = vector.broadcast %cst_28 : f32 to vector<1x100xf32>
    %79 = arith.mulf %78, %1 : vector<1x100xf32>
    %80 = arith.mulf %79, %1 : vector<1x100xf32>
    %81 = arith.subf %77, %80 : vector<1x100xf32>
    %82 = arith.mulf %76, %81 : vector<1x100xf32>
    %c0_29 = arith.constant 0 : index
    %c0_30 = arith.constant 0 : index
    %83 = vector.load %arg3[%c0_29, %c0_30] : memref<16x100xf32, #tpu.memory_space<vmem>>, vector<1x100xf32>
    tpu.vector_store %arg3[%c0_29, %c0_30], %5 {strides = array<i32>} : memref<16x100xf32, #tpu.memory_space<vmem>>, vector<1x100xf32>,
    %c1_31 = arith.constant 1 : index
    %c0_32 = arith.constant 0 : index
    %84 = vector.load %arg3[%c1_31, %c0_32] : memref<16x100xf32, #tpu.memory_space<vmem>>, vector<1x100xf32>
    tpu.vector_store %arg3[%c1_31, %c0_32], %7 {strides = array<i32>} : memref<16x100xf32, #tpu.memory_space<vmem>>, vector<1x100xf32>,
    %c2_33 = arith.constant 2 : index
    %c0_34 = arith.constant 0 : index
    %85 = vector.load %arg3[%c2_33, %c0_34] : memref<16x100xf32, #tpu.memory_space<vmem>>, vector<1x100xf32>
    tpu.vector_store %arg3[%c2_33, %c0_34], %9 {strides = array<i32>} : memref<16x100xf32, #tpu.memory_space<vmem>>, vector<1x100xf32>,
    %c3 = arith.constant 3 : index
    %c0_35 = arith.constant 0 : index
    %86 = vector.load %arg3[%c3, %c0_35] : memref<16x100xf32, #tpu.memory_space<vmem>>, vector<1x100xf32>
    tpu.vector_store %arg3[%c3, %c0_35], %11 {strides = array<i32>} : memref<16x100xf32, #tpu.memory_space<vmem>>, vector<1x100xf32>,
    %c4 = arith.constant 4 : index
    %c0_36 = arith.constant 0 : index
    %87 = vector.load %arg3[%c4, %c0_36] : memref<16x100xf32, #tpu.memory_space<vmem>>, vector<1x100xf32>
    tpu.vector_store %arg3[%c4, %c0_36], %14 {strides = array<i32>} : memref<16x100xf32, #tpu.memory_space<vmem>>, vector<1x100xf32>,
    %c5 = arith.constant 5 : index
    %c0_37 = arith.constant 0 : index
    %88 = vector.load %arg3[%c5, %c0_37] : memref<16x100xf32, #tpu.memory_space<vmem>>, vector<1x100xf32>
    tpu.vector_store %arg3[%c5, %c0_37], %17 {strides = array<i32>} : memref<16x100xf32, #tpu.memory_space<vmem>>, vector<1x100xf32>,
    %c6 = arith.constant 6 : index
    %c0_38 = arith.constant 0 : index
    %89 = vector.load %arg3[%c6, %c0_38] : memref<16x100xf32, #tpu.memory_space<vmem>>, vector<1x100xf32>
    tpu.vector_store %arg3[%c6, %c0_38], %24 {strides = array<i32>} : memref<16x100xf32, #tpu.memory_space<vmem>>, vector<1x100xf32>,
    %c7 = arith.constant 7 : index
    %c0_39 = arith.constant 0 : index
    %90 = vector.load %arg3[%c7, %c0_39] : memref<16x100xf32, #tpu.memory_space<vmem>>, vector<1x100xf32>
    tpu.vector_store %arg3[%c7, %c0_39], %27 {strides = array<i32>} : memref<16x100xf32, #tpu.memory_space<vmem>>, vector<1x100xf32>,
    %c8 = arith.constant 8 : index
    %c0_40 = arith.constant 0 : index
    %91 = vector.load %arg3[%c8, %c0_40] : memref<16x100xf32, #tpu.memory_space<vmem>>, vector<1x100xf32>
    tpu.vector_store %arg3[%c8, %c0_40], %32 {strides = array<i32>} : memref<16x100xf32, #tpu.memory_space<vmem>>, vector<1x100xf32>,
    %c9 = arith.constant 9 : index
    %c0_41 = arith.constant 0 : index
    %92 = vector.load %arg3[%c9, %c0_41] : memref<16x100xf32, #tpu.memory_space<vmem>>, vector<1x100xf32>
    tpu.vector_store %arg3[%c9, %c0_41], %40 {strides = array<i32>} : memref<16x100xf32, #tpu.memory_space<vmem>>, vector<1x100xf32>,
    %c10 = arith.constant 10 : index
    %c0_42 = arith.constant 0 : index
    %93 = vector.load %arg3[%c10, %c0_42] : memref<16x100xf32, #tpu.memory_space<vmem>>, vector<1x100xf32>
    tpu.vector_store %arg3[%c10, %c0_42], %44 {strides = array<i32>} : memref<16x100xf32, #tpu.memory_space<vmem>>, vector<1x100xf32>,
    %c11 = arith.constant 11 : index
    %c0_43 = arith.constant 0 : index
    %94 = vector.load %arg3[%c11, %c0_43] : memref<16x100xf32, #tpu.memory_space<vmem>>, vector<1x100xf32>
    tpu.vector_store %arg3[%c11, %c0_43], %52 {strides = array<i32>} : memref<16x100xf32, #tpu.memory_space<vmem>>, vector<1x100xf32>,
    %c12 = arith.constant 12 : index
    %c0_44 = arith.constant 0 : index
    %95 = vector.load %arg3[%c12, %c0_44] : memref<16x100xf32, #tpu.memory_space<vmem>>, vector<1x100xf32>
    tpu.vector_store %arg3[%c12, %c0_44], %60 {strides = array<i32>} : memref<16x100xf32, #tpu.memory_space<vmem>>, vector<1x100xf32>,
    %c13 = arith.constant 13 : index
    %c0_45 = arith.constant 0 : index
    %96 = vector.load %arg3[%c13, %c0_45] : memref<16x100xf32, #tpu.memory_space<vmem>>, vector<1x100xf32>
    tpu.vector_store %arg3[%c13, %c0_45], %68 {strides = array<i32>} : memref<16x100xf32, #tpu.memory_space<vmem>>, vector<1x100xf32>,
    %c14 = arith.constant 14 : index
    %c0_46 = arith.constant 0 : index
    %97 = vector.load %arg3[%c14, %c0_46] : memref<16x100xf32, #tpu.memory_space<vmem>>, vector<1x100xf32>
    tpu.vector_store %arg3[%c14, %c0_46], %74 {strides = array<i32>} : memref<16x100xf32, #tpu.memory_space<vmem>>, vector<1x100xf32>,
    %c15 = arith.constant 15 : index
    %c0_47 = arith.constant 0 : index
    %98 = vector.load %arg3[%c15, %c0_47] : memref<16x100xf32, #tpu.memory_space<vmem>>, vector<1x100xf32>
    tpu.vector_store %arg3[%c15, %c0_47], %82 {strides = array<i32>} : memref<16x100xf32, #tpu.memory_space<vmem>>, vector<1x100xf32>,
    %c0_48 = arith.constant 0 : index
    %c0_49 = arith.constant 0 : index
    %99 = vector.load %arg0[%c0_48, %c0_49] : memref<8x16xf32, #tpu.memory_space<vmem>>, vector<8x16xf32>
    %c0_50 = arith.constant 0 : index
    %c0_51 = arith.constant 0 : index
    %100 = vector.load %arg3[%c0_50, %c0_51] : memref<16x100xf32, #tpu.memory_space<vmem>>, vector<16x100xf32>
    %cst_52 = arith.constant dense<0.000000e+00> : vector<8x100xf32>
    %101 = tpu.matmul %99, %100, %cst_52 {dimension_numbers = #tpu.dot_dimension_numbers<[1], [0], [0], [1], [0, 0, 1, 1], [], []>} : vector<8x16xf32>, vector<16x100xf32>, vector<8x100xf32> -> vector<8x100xf32>
    %102 = math.absf %101 : vector<8x100xf32>
    %103 = vector.extract_strided_slice %102 {offsets = [0, 0], sizes = [4, 100], strides = [1, 1]} : vector<8x100xf32> to vector<4x100xf32>
    %104 = vector.extract_strided_slice %102 {offsets = [4, 0], sizes = [4, 100], strides = [1, 1]} : vector<8x100xf32> to vector<4x100xf32>
    %105 = arith.minimumf %103, %104 : vector<4x100xf32>
    %106 = vector.shape_cast %105 : vector<4x100xf32> to vector<1x4x100xf32>
    %cst_53 = arith.constant dense<0.000000e+00> : vector<1xf32>
    %107 = vector.multi_reduction <add>, %106, %cst_53 [1, 2] : vector<1x4x100xf32> to vector<1xf32>
    %108 = vector.shape_cast %107 : vector<1xf32> to vector<1x1x1xf32>
    %109 = vector.extract %108[0, 0, 0] : f32 from vector<1x1x1xf32>
    %110 = vector.broadcast %109 : f32 to vector<1x1xf32>
    %111 = arith.maximumf %103, %104 : vector<4x100xf32>
    %112 = vector.shape_cast %111 : vector<4x100xf32> to vector<1x4x100xf32>
    %cst_54 = arith.constant dense<0.000000e+00> : vector<1xf32>
    %113 = vector.multi_reduction <add>, %112, %cst_54 [1, 2] : vector<1x4x100xf32> to vector<1xf32>
    %114 = vector.shape_cast %113 : vector<1xf32> to vector<1x1x1xf32>
    %115 = vector.extract %114[0, 0, 0] : f32 from vector<1x1x1xf32>
    %116 = vector.broadcast %115 : f32 to vector<1x1xf32>
    %117 = math.log %116 : vector<1x1xf32>
    %118 = math.log %110 : vector<1x1xf32>
    %119 = arith.subf %117, %118 : vector<1x1xf32>
    %c0_55 = arith.constant 0 : index
    %c0_56 = arith.constant 0 : index
    %120 = vector.load %arg2[%c0_55, %c0_56] : memref<1x1xf32, #tpu.memory_space<vmem>>, vector<1x1xf32>
    tpu.vector_store %arg2[%c0_55, %c0_56], %119 {strides = array<i32>} : memref<1x1xf32, #tpu.memory_space<vmem>>, vector<1x1xf32>,
    return
  }
}

</mosaic_0001>

<bundles_post_ra>
// kernel: _iou_loss_impl.1
= control target key start
LH: loop header
LB: loop body
LE: loop exit
PB: predicated region body
PF: predicated region fallthrough
CT: control target
= control target key end

     0   :  { %vm56_vm0 = vcmask 811008   ;;  %v248_v2 = vmov 0.0   ;;  %s301_s0 = inlined_call_operand.vmem [shape: f32[8,16], index: 0, kind: input, shape index: {}]   ;;  %s302_s1 = inlined_call_operand.vmem [shape: f32[3,100], index: 1, kind: input, shape index: {}]   ;;  %s303_s2 = inlined_call_operand.hbm [shape: f32[1,1], index: 2, kind: output, shape index: {}]  }
   0x1   :  { %v12_v0 = vld [vmem:[%s302_s1] sm:$0x1]  ;;  %v13_v1 = vld [vmem:[%s302_s1 + $0x1] sm:$0x1]  ;;  %207 = vmatprep.subr.mxu0 %v248_v2  ;;  %v14_v3 = vld [vmem:[%s302_s1 + $0x2] sm:$0x1] }
   0x2   :  { %v27_v4 = vmul.f32 %v12_v0, %v12_v0  ;;  %v28_v5 = vmul.f32 %v13_v1, %v13_v1  ;;  %v31_v6 = vmul.f32 0.5900436, %v13_v1  ;;  %v32_v7 = vmul.f32 3.0, %v12_v0 }
   0x3   :  { %v36_v8 = vmul.f32 2.8906114, %v12_v0  ;;  %v39_v9 = vmul.f32 0.4570458, %v13_v1  ;;  %v40_v10 = vmul.f32 5.0, %v14_v3  ;;  %v52_v11 = vmul.f32 3.0, %v13_v1 }
   0x4   :  { %v29_v12 = vsub.f32 %v27_v4, %v28_v5  ;;  %v33_v13 = vmul.f32 %v32_v7, %v12_v0  ;;  %v44_v14 = vmul.f32 0.37317634, %v14_v3  ;;  %v47_v15 = vmul.f32 0.4570458, %v12_v0 }
   0x5   :  { %7 = vsyncpa [#allocation4], 0  ;;  %v37_v16 = vmul.f32 %v36_v8, %v13_v1  ;;  %v41_v17 = vmul.f32 %v40_v10, %v14_v3  ;;  %v49_v18 = vmul.f32 1.4453057, %v14_v3  ;;  %v51_v19 = vmul.f32 0.5900436, %v12_v0 }
   0x6   :  { %v30_v20 = vmul.f32 0.54627424, %v29_v12  ;;  %v34_v21 = vsub.f32 %v33_v13, %v28_v5  ;;  %v53_v22 = vmul.f32 %v52_v11, %v13_v1  ;;  %v15_v23 = vmul.f32 0.48860252, %v13_v1  ;;  %v73_v47 = vld [vmem:[%s301_s0] sm:$0xff]  ;;  %s251_s17 = smov [#allocation3]  }
   0x7   :  { %v38_v24 = vmul.f32 %v37_v16, %v14_v3  ;;  %v201_v25 = vadd.f32 -1.0, %v41_v17  ;;  %v202_v26 = vadd.f32 -3.0, %v41_v17  ;;  %v50_v27 = vmul.f32 %v49_v18, %v29_v12  ;;  %s192_s18 = sshll.u32 %s251_s17, 4  ;;  %s193_s18 = int_to_ptr.vmem [resolvable:$true] %s192_s18 }
   0x8   :  { %v35_v28 = vmul.f32 %v34_v21, %v31_v6  ;;  %v54_v29 = vsub.f32 %v27_v4, %v53_v22  ;;  %65 = vst.msk [vmem:[#allocation2 + $0x8] sm:$0x1] %vm56_vm0, %v30_v20  ;;  %v16_v30 = vmul.f32 0.48860252, %v14_v3  ;;  %v17_v31 = vmul.f32 0.48860252, %v12_v0  ;;  %p231_p1 = scmp.lt.s32.totalorder %s193_s18, %s193_s18 }
   0x9   :  { %58 = vst.msk [vmem:[#allocation2 + $0x1] sm:$0x1] %vm56_vm0, %v15_v23  ;;  %v43_v32 = vmul.f32 %v201_v25, %v39_v9  ;;  %v46_v33 = vmul.f32 %v202_v26, %v44_v14  ;;  %v48_v34 = vmul.f32 %v201_v25, %v47_v15  ;;  %67 = vst.msk [vmem:[#allocation2 + $0xa] sm:$0x1] %vm56_vm0, %v38_v24  ;;  %v18_v35 = vmul.f32 1.0925485, %v12_v0 }
   0xa   :  { %71 = vst.msk [vmem:[#allocation2 + $0xe] sm:$0x1] %vm56_vm0, %v50_v27  ;;  %v55_v36 = vmul.f32 %v54_v29, %v51_v19  ;;  %66 = vst.msk [vmem:[#allocation2 + $0x9] sm:$0x1] %vm56_vm0, %v35_v28  ;;  %v20_v37 = vmul.f32 1.0925485, %v13_v1 }
   0xb   :  { %v22_v38 = vmul.f32 3.0, %v14_v3  ;;  %59 = vst.msk [vmem:[#allocation2 + $0x2] sm:$0x1] %vm56_vm0, %v16_v30  ;;  %60 = vst.msk [vmem:[#allocation2 + $0x3] sm:$0x1] %vm56_vm0, %v17_v31  ;;  %v19_v39 = vmul.f32 %v18_v35, %v13_v1  ;;  %v26_v40 = vmul.f32 %v18_v35, %v14_v3  ;;  %vm250_vm1 = vmmov 0  }
   0xc   :  { %68 = vst.msk [vmem:[#allocation2 + $0xb] sm:$0x1] %vm56_vm0, %v43_v32  ;;  %69 = vst.msk [vmem:[#allocation2 + $0xc] sm:$0x1] %vm56_vm0, %v46_v33  ;;  %v249_v41 = vmov 0.2820948   ;;  %v21_v42 = vmul.f32 %v20_v37, %v14_v3  ;;  %211 = vmatprep.mubr.msk.f32.mxu0 %vm250_vm1, %v248_v2 }
   0xd   :  { %70 = vst.msk [vmem:[#allocation2 + $0xd] sm:$0x1] %vm56_vm0, %v48_v34  ;;  %57 = vst.msk [vmem:[#allocation2] sm:$0x1] %vm56_vm0, %v249_v41  ;;  %v23_v43 = vmul.f32 %v22_v38, %v14_v3  ;;  %vm76_vm2 = vcmask 130048   ;;  %vm155_vm3 = vcmask 814080  }
   0xe   :  { %72 = vst.msk [vmem:[#allocation2 + $0xf] sm:$0x1] %vm56_vm0, %v55_v36  ;;  %61 = vst.msk [vmem:[#allocation2 + $0x4] sm:$0x1] %vm56_vm0, %v19_v39  ;;  %vm184_vm4 = vcmask 0   ;;  %s226_s19 = scalar_lea.vmem %s193_s18, 16 }
   0xf   :  { %64 = vst.msk [vmem:[#allocation2 + $0x7] sm:$0x1] %vm56_vm0, %v26_v40  ;;  %v200_v44 = vadd.f32 -1.0, %v23_v43  ;;  %62 = vst.msk [vmem:[#allocation2 + $0x5] sm:$0x1] %vm56_vm0, %v21_v42  ;;  %p227_p0 = scmp.ne.s32.totalorder %s193_s18, %s226_s19  ;;  %s230_s20 = scalar_lea.vmem %s193_s18, 32 }
  0x10   :  { %p232_p2 = scmp.lt.s32.totalorder %s230_s20, %s226_s19 }
  0x11   :  { %v25_v45 = vmul.f32 0.31539157, %v200_v44 }
  0x12   :  { %p233_p3 = por %p232_p2, %p231_p1 }
  0x13   :  { %63 = vst.msk [vmem:[#allocation2 + $0x6] sm:$0x1] %vm56_vm0, %v25_v45 }
  0x14   :  { %p234_p4 = pnand %p233_p3, %p227_p0 }
  0x15   :  { %v75_v46 = vld [vmem:[#allocation2 + $0x8] sm:$0xff] }
  0x16   :  { %208 = vmatpush3.msra.mxu0 %v75_v46 }
  0x17   :  { %209 = vmatprep.subr.mxu0 %v248_v2 }
  0x1a   :  { %v74_v48 = vld [vmem:[#allocation2] sm:$0xff] }
  0x1b   :  { %210 = vmatpush3.msra.mxu0 %v74_v48 }
  0x1c   :  { %212 = vmatmul.mubr.msk.f32.vlgmr.msra.gmra.mxu0 %vm76_vm2, %v73_v47 }
  0xdc   :  { %v146_v49 = vpop.f32.mrf.mxu0 }
  0xdd   :  { %v150_v50 = vand.u32 2147483647, %v146_v49 }
  0xde   :  { %v213_v51 = vpop.f32.mrf.mxu0 }
  0xdf   :  { %v152_v52 = vrot.slane %v150_v50, 4 }
  0xe1   :  { %v154_v53 = vmin.f32 %v150_v50, %v152_v52  ;;  %v167_v55 = vmax.f32 %v150_v50, %v152_v52 }
  0xe3   :  { %v156_v54 = vsel %vm155_vm3, %v154_v53, 0.0  ;;  %v168_v56 = vsel %vm155_vm3, %v167_v55, 0.0 }
  0xe4   :  { %157 = vadd.xlane.f32.xlu0 %v156_v54 }
  0xe8   :  { %169 = vadd.xlane.f32.xlu0 %v168_v56 }
 0x16d   :  { %v158_v57 = vpop.xlane.xlu0 %157 }
 0x16e   :  { %v159_v58 = vrot.slane %v158_v57, 4 }
 0x170   :  { %v160_v59 = vadd.f32 %v159_v58, %v158_v57 }
 0x171   :  { %v170_v60 = vpop.xlane.xlu0 %169 }
 0x172   :  { %v161_v61 = vrot.slane %v160_v59, 2  ;;  %v171_v62 = vrot.slane %v170_v60, 4 }
 0x174   :  { %v172_v63 = vadd.f32 %v171_v62, %v170_v60  ;;  %v162_v0 = vadd.f32 %v161_v61, %v160_v59 }
 0x176   :  { %v173_v1 = vrot.slane %v172_v63, 2  ;;  %v163_v2 = vrot.slane %v162_v0, 1 }
 0x178   :  { %v174_v3 = vadd.f32 %v173_v1, %v172_v63  ;;  %v164_v4 = vadd.f32 %v163_v2, %v162_v0 }
 0x17a   :  { %214 = vpush %v164_v4  ;;  %v175_v5 = vrot.slane %v174_v3, 1 }
 0x17c   :  { %v176_v6 = vadd.f32 %v175_v5, %v174_v3 }
 0x17e   :  { %216 = vpush %v176_v6 }
 0x1ab   :  { %s215_s0 = spop %214 }
 0x1ac   :  { %v166_v7 = vstv %s215_s0 }
 0x1ad   :  { %222 = vlog2.f32 %v166_v7 }
 0x1af   :  { %s217_s16 = spop %216 }
 0x1b0   :  { %v178_v8 = vstv %s217_s16 }
 0x1b1   :  { %224 = vlog2.f32 %v178_v8 }
 0x1ba   :  { %v223_v9 = vpop.eup %222 }
 0x1bb   :  { %v182_v11 = vmul.f32 0.6931472, %v223_v9 }
 0x1be   :  { %v225_v10 = vpop.eup %224 }
 0x1bf   :  { %v180_v12 = vmul.f32 0.6931472, %v225_v10 }
 0x1c1   :  { %v183_v13 = vsub.f32 %v180_v12, %v182_v11 }
 0x1c3   :  { %185 = vst.msk [vmem:[#allocation3] sm:$0x1] %vm184_vm4, %v183_v13 }
 0x1c4   :  { %237 = shalt.err (!%p234_p4)
}
 0x1c5   :  { %195 = dma.vmem_to_hbm [thread:$0]  %s193_s18, 16, %s303_s2, [#allocation4]  }
 0x1c6   :  { %246 = dma.done.wait [#allocation4], 16  }
 0x1c7   :  { %247 = vsyncadd [#allocation4], 4294967280 }
 0x1c8   :  { %199 = vsyncpa [#allocation4], 1 }

</bundles_post_ra>
